<compile_context>
chip_gen: v7x
topology: tpu7x:2x2x1
jax: 0.10.0
libtpu: 0.0.40
codegen_flags: <defaults>
</compile_context>

<pallas_src>
import functools

import jax
import jax.numpy as jnp
from jax.experimental import pallas as pl
from jax.experimental.pallas import tpu as pltpu


# ------------------------------ helpers ------------------------------------

def _round_up(x, m):
    return (x + m - 1) // m * m


def _apply_act(y, act):
    if act == "relu":
        return jnp.maximum(y, 0.0)
    if act == "sigmoid":
        return jax.nn.sigmoid(y)
    # NOTE: no in-kernel softmax — with a tiled N axis a per-block softmax
    # would normalize over a partial row; softmax is applied in the wrapper.
    return y


# ----------------------------- Pallas kernels ------------------------------

def _matmul_kernel(x_ref, w_ref, b_ref, o_ref, acc_ref, *, act):
    """One (tm, tn) output tile of act(x @ W + b), reduced over the K grid axis."""
    k = pl.program_id(2)

    @pl.when(k == 0)
    def _():
        acc_ref[...] = jnp.zeros_like(acc_ref)

    acc_ref[...] += jnp.dot(x_ref[...], w_ref[...],
                            preferred_element_type=jnp.float32)

    @pl.when(k == pl.num_programs(2) - 1)
    def _():
        y = acc_ref[...] + b_ref[...]
        o_ref[...] = _apply_act(y, act).astype(o_ref.dtype)


def _gcn_kernel(adj_ref, x_ref, w_ref, b_ref, o_ref, acc_ref, *, act):
    """One (tm, tn) tile of act(adj @ (x @ W) + b), reduced over the node axis.

    The (tj, tn) s = x@W tile lives only in registers/VMEM — no HBM roundtrip.
    """
    j = pl.program_id(2)

    @pl.when(j == 0)
    def _():
        acc_ref[...] = jnp.zeros_like(acc_ref)

    s = jnp.dot(x_ref[...], w_ref[...], preferred_element_type=jnp.float32)
    acc_ref[...] += jnp.dot(adj_ref[...], s, preferred_element_type=jnp.float32)

    @pl.when(j == pl.num_programs(2) - 1)
    def _():
        y = acc_ref[...] + b_ref[...]
        o_ref[...] = _apply_act(y, act).astype(o_ref.dtype)


# ------------------------------ kernel wrappers -----------------------------

# Tile caps sized against v7x's 64 MiB physical / 32 MiB scoped VMEM:
# largest f32 block at these caps is 512*512*4 = 1 MiB; with double-buffered
# inputs + output + accumulator that is well under 8 MiB.
_TM_MAX = 512
_TN_MAX = 512
_TK_MAX = 512

_GCN_TM_MAX = 256
_GCN_TN_MAX = 256
_GCN_TJ_MAX = 256

_DIM_SEMANTICS = ("parallel", "parallel", "arbitrary")


def pallas_linear(x, w, b=None, act="none"):
    """act(x @ W + b) with a tiled, pipelined Pallas matmul.

    Inputs are zero-padded to tile multiples; narrow outputs are written as a
    lane-dense (>=128-wide) slab and sliced back here (free layout plumbing).
    """
    M, K = x.shape
    K2, N = w.shape
    assert K == K2

    tm = min(_TM_MAX, _round_up(M, 8))
    tk = min(_TK_MAX, _round_up(K, 128))
    tn = min(_TN_MAX, _round_up(N, 128))
    Mp, Kp, Np = _round_up(M, tm), _round_up(K, tk), _round_up(N, tn)

    xp = jnp.pad(x, ((0, Mp - M), (0, Kp - K))) if (Mp, Kp) != (M, K) else x
    wp = jnp.pad(w, ((0, Kp - K), (0, Np - N))) if (Kp, Np) != (K, N) else w
    if b is None:
        bp = jnp.zeros((1, Np), jnp.float32)
    else:
        bp = jnp.pad(b.reshape(1, N).astype(jnp.float32), ((0, 0), (0, Np - N)))

    grid = (Mp // tm, Np // tn, Kp // tk)
    out = pl.pallas_call(
        functools.partial(_matmul_kernel, act=act),
        out_shape=jax.ShapeDtypeStruct((Mp, Np), jnp.float32),
        grid=grid,
        in_specs=[
            pl.BlockSpec((tm, tk), lambda i, j, k: (i, k)),
            pl.BlockSpec((tk, tn), lambda i, j, k: (k, j)),
            pl.BlockSpec((1, tn), lambda i, j, k: (0, j)),
        ],
        out_specs=pl.BlockSpec((tm, tn), lambda i, j, k: (i, j)),
        scratch_shapes=[pltpu.VMEM((tm, tn), jnp.float32)],
        compiler_params=pltpu.CompilerParams(
            dimension_semantics=_DIM_SEMANTICS),
    )(xp, wp, bp)

    if (Mp, Np) != (M, N):
        out = out[:M, :N]
    return out


def pallas_gcn(adj, x, w, b, act="none"):
    """act(adj @ (x @ W) + b) — fused GCNConv as one tiled Pallas kernel."""
    M, J = adj.shape
    J2, K = x.shape
    K2, N = w.shape
    assert J == J2 and K == K2

    tm = min(_GCN_TM_MAX, _round_up(M, 8))
    tj = min(_GCN_TJ_MAX, _round_up(J, 128))
    tn = min(_GCN_TN_MAX, _round_up(N, 128))
    Kp = _round_up(K, 128)  # feature dim kept whole (small for GCN layers)
    Mp, Jp, Np = _round_up(M, tm), _round_up(J, tj), _round_up(N, tn)

    adjp = jnp.pad(adj, ((0, Mp - M), (0, Jp - J))) if (Mp, Jp) != (M, J) else adj
    xp = jnp.pad(x, ((0, Jp - J), (0, Kp - K))) if (Jp, Kp) != (J, K) else x
    wp = jnp.pad(w, ((0, Kp - K), (0, Np - N))) if (Kp, Np) != (K, N) else w
    bp = jnp.pad(b.reshape(1, N).astype(jnp.float32), ((0, 0), (0, Np - N)))

    grid = (Mp // tm, Np // tn, Jp // tj)
    out = pl.pallas_call(
        functools.partial(_gcn_kernel, act=act),
        out_shape=jax.ShapeDtypeStruct((Mp, Np), jnp.float32),
        grid=grid,
        in_specs=[
            pl.BlockSpec((tm, tj), lambda i, n, j: (i, j)),   # adj row/col tile
            pl.BlockSpec((tj, Kp), lambda i, n, j: (j, 0)),   # x rows for this j
            pl.BlockSpec((Kp, tn), lambda i, n, j: (0, n)),   # W column tile
            pl.BlockSpec((1, tn), lambda i, n, j: (0, n)),    # bias tile
        ],
        out_specs=pl.BlockSpec((tm, tn), lambda i, n, j: (i, n)),
        scratch_shapes=[pltpu.VMEM((tm, tn), jnp.float32)],
        compiler_params=pltpu.CompilerParams(
            dimension_semantics=_DIM_SEMANTICS),
    )(adjp, xp, wp, bp)

    if (Mp, Np) != (M, N):
        out = out[:M, :N]
    return out


# ------------------------------ model forward ------------------------------

@jax.jit
def vsepacat_forward(params, features, adj, recon_edges):
    """Eval-mode forward of VSEPACAT (dropout=0, reparameterize -> mu)."""
    L = params["gcmu_b"].shape[0]          # latent_dim
    C = params["pred_b"].shape[0]          # num_classes
    twoL = 2 * L

    # --- VEncoder (GCN): h = relu(adj @ (x@W1) + b1) ---
    h = pallas_gcn(adj, features, params["gc1_w"], params["gc1_b"], act="relu")

    # Fused mu/logvar GCN head: adj streamed once for both outputs.
    w_muv_a = jnp.concatenate([params["gcmu_w"], params["gclv_w"]], axis=1)
    b_muv_a = jnp.concatenate([params["gcmu_b"], params["gclv_b"]], axis=0)
    muv_a = pallas_gcn(adj, h, w_muv_a, b_muv_a)
    mu_a, logvar_a = muv_a[:, :L], muv_a[:, L:twoL]

    # --- VMLP encoder on raw features (fused mu/logvar head) ---
    hx = pallas_linear(features, params["mlp1_w"], params["mlp1_b"], act="relu")
    w_muv_x = jnp.concatenate([params["mlpmu_w"], params["mlplv_w"]], axis=1)
    b_muv_x = jnp.concatenate([params["mlpmu_b"], params["mlplv_b"]], axis=0)
    muv_x = pallas_linear(hx, w_muv_x, b_muv_x)
    mu_x, logvar_x = muv_x[:, :L], muv_x[:, L:twoL]

    # reparameterize(mu, logvar, training=False) == mu
    za, zx = mu_a, mu_x
    z = jnp.concatenate([za, zx], axis=1)  # [N, 2*latent_dim]

    # --- batched z-heads: pred logits + decoder left/right projections ------
    # ConcatDecoder identity: sigmoid(cat(z_i, z_j) @ W + b)
    #                        == sigmoid((z @ W[:2L])_i + (z @ W[2L:])_j + b)
    w_left = params["dec_w"][:twoL]        # [2L, 1]
    w_right = params["dec_w"][twoL:]       # [2L, 1]
    w_heads = jnp.concatenate([params["pred_w"], w_left, w_right], axis=1)
    b_heads = jnp.concatenate(
        [params["pred_b"], jnp.zeros((2,), jnp.float32)], axis=0)
    heads = pallas_linear(z, w_heads, b_heads)          # [N, C+2] (lane-dense slab inside)
    logits = heads[:, :C]
    p_left = heads[:, C]
    p_right = heads[:, C + 1]

    # full-row softmax over the tiny [N, num_classes] logits (wrapper epilogue)
    pred = jax.nn.softmax(logits, axis=-1)

    # per-edge gather + add + sigmoid: O(E) elementwise, plain JAX epilogue
    # TODO(synk): original ConcatDecoder samples pos/neg edges from data; a
    #             fixed deterministic edge list is used as recon_edges here.
    src, dst = recon_edges
    adj_recon = jax.nn.sigmoid(p_left[src] + p_right[dst] + params["dec_b"][0])
    adj_recon = adj_recon[:, None]                       # [E, 1]

    # --- feature decoder MLP: sigmoid(Linear(relu(Linear(zx)))) ---
    # TODO(synk): d1->d2 (and mlp1->mu/logvar) chains could be fused into a
    #             single 2-layer kernel keeping the hidden in VMEM.
    hd = pallas_linear(zx, params["d1_w"], params["d1_b"], act="relu")
    feat_recon = pallas_linear(hd, params["d2_w"], params["d2_b"], act="sigmoid")

    return {
        "adj_recon": adj_recon,
        "recon_edges": recon_edges,
        "feat_recon": feat_recon,
        "pred": pred,
        "z": z,
        "mu_a": mu_a,
        "logvar_a": logvar_a,
        "mu_x": mu_x,
        "logvar_x": logvar_x,
    }


# Pure-JAX reference for correctness checking (mirrors the torch module).
def reference_forward(params, features, adj, recon_edges):
    relu = lambda v: jnp.maximum(v, 0.0)
    h = relu(adj @ (features @ params["gc1_w"]) + params["gc1_b"])
    mu_a = adj @ (h @ params["gcmu_w"]) + params["gcmu_b"]
    logvar_a = adj @ (h @ params["gclv_w"]) + params["gclv_b"]
    hx = relu(features @ params["mlp1_w"] + params["mlp1_b"])
    mu_x = hx @ params["mlpmu_w"] + params["mlpmu_b"]
    logvar_x = hx @ params["mlplv_w"] + params["mlplv_b"]
    z = jnp.concatenate([mu_a, mu_x], axis=1)
    pred = jax.nn.softmax(z @ params["pred_w"] + params["pred_b"], axis=-1)
    src, dst = recon_edges
    zcat = jnp.concatenate([z[src], z[dst]], axis=1)
    adj_recon = jax.nn.sigmoid(zcat @ params["dec_w"] + params["dec_b"])
    hd = relu(mu_x @ params["d1_w"] + params["d1_b"])
    feat_recon = jax.nn.sigmoid(hd @ params["d2_w"] + params["d2_b"])
    return {
        "adj_recon": adj_recon, "feat_recon": feat_recon, "pred": pred,
        "z": z, "mu_a": mu_a, "logvar_a": logvar_a,
        "mu_x": mu_x, "logvar_x": logvar_x,
    }


# ------------------------------- param setup -------------------------------

def init_params(key, num_features, nhid, latent_dim, num_classes):
    def glorot(k, shape):
        fan_in, fan_out = shape
        s = jnp.sqrt(6.0 / (fan_in + fan_out))
        return jax.random.uniform(k, shape, jnp.float32, -s, s)

    names_shapes = {
        # GCN encoder
        "gc1_w": (num_features, nhid), "gc1_b": (nhid,),
        "gcmu_w": (nhid, latent_dim), "gcmu_b": (latent_dim,),
        "gclv_w": (nhid, latent_dim), "gclv_b": (latent_dim,),
        # VMLP encoder
        "mlp1_w": (num_features, nhid), "mlp1_b": (nhid,),
        "mlpmu_w": (nhid, latent_dim), "mlpmu_b": (latent_dim,),
        "mlplv_w": (nhid, latent_dim), "mlplv_b": (latent_dim,),
        # predlabel: Linear(latent_dim*2, num_classes)
        "pred_w": (2 * latent_dim, num_classes), "pred_b": (num_classes,),
        # ConcatDecoder: Linear(2 * (latent_dim*2), 1)
        "dec_w": (4 * latent_dim, 1), "dec_b": (1,),
        # mlpdec: MLP(latent_dim, nhid, num_features, act=sigmoid)
        "d1_w": (latent_dim, nhid), "d1_b": (nhid,),
        "d2_w": (nhid, num_features), "d2_b": (num_features,),
    }
    params = {}
    keys = jax.random.split(key, len(names_shapes))
    for k, (name, shape) in zip(keys, sorted(names_shapes.items())):
        if len(shape) == 1:
            params[name] = jnp.zeros(shape, jnp.float32)
        else:
            params[name] = glorot(k, shape)
    return params


def make_graph(key, num_nodes, num_features, num_edges):
    kf, ka = jax.random.split(key)
    features = jax.random.normal(kf, (num_nodes, num_features), jnp.float32)
    # random symmetric binary adjacency + self loops, sym-normalized
    raw = jax.random.uniform(ka, (num_nodes, num_nodes)) < 0.3
    a = jnp.logical_or(raw, raw.T).astype(jnp.float32)
    a = a + jnp.eye(num_nodes, dtype=jnp.float32)
    a = jnp.minimum(a, 1.0)
    d = jnp.sum(a, axis=1)
    dinv = 1.0 / jnp.sqrt(d)
    adj = a * dinv[:, None] * dinv[None, :]
    # deterministic reconstruction edge list
    idx = jnp.arange(num_edges)
    recon_edges = (idx % num_nodes, (3 * idx + 1) % num_nodes)
    return features, adj, recon_edges


# ----------------------------------- main -----------------------------------

if __name__ == "__main__":
    num_nodes, num_features = 8, 16
    nhid, latent_dim, num_classes = 32, 16, 4
    num_edges = 16

    key = jax.random.PRNGKey(0)
    kp, kg = jax.random.split(key)
    params = init_params(kp, num_features, nhid, latent_dim, num_classes)
    features, adj, recon_edges = make_graph(kg, num_nodes, num_features, num_edges)

    out = vsepacat_forward(params, features, adj, recon_edges)
    out = jax.tree_util.tree_map(jax.block_until_ready, out)

    ref = reference_forward(params, features, adj, recon_edges)
    for name in ("mu_a", "logvar_a", "mu_x", "logvar_x", "z",
                 "pred", "adj_recon", "feat_recon"):
        assert jnp.allclose(out[name], ref[name], atol=1e-4, rtol=1e-4), name

    print("KERNEL_OK")
</pallas_src>

<mosaic_0001>
module attributes {stable_mosaic.version = 11 : i64} {
  func.func @_gcn_kernel(%arg0: i32, %arg1: i32, %arg2: i32, %arg3: memref<8x128xf32, #tpu.memory_space<vmem>>, %arg4: memref<128x128xf32, #tpu.memory_space<vmem>>, %arg5: memref<128x128xf32, #tpu.memory_space<vmem>>, %arg6: memref<1x128xf32, #tpu.memory_space<vmem>>, %arg7: memref<8x128xf32, #tpu.memory_space<vmem>>, %arg8: memref<8x128xf32, #tpu.memory_space<vmem>>) attributes {dimension_semantics = [#tpu.dimension_semantics<parallel>, #tpu.dimension_semantics<parallel>, #tpu.dimension_semantics<arbitrary>], iteration_bounds = array<i64: 1, 1, 1>, scalar_prefetch = 0 : i64, scratch_operands = 1 : i64, tpu.core_type = #tpu.core_type<tc>, window_params = [{transform_indices = @transform_0, window_bounds = array<i64: 8, 128>}, {transform_indices = @transform_1, window_bounds = array<i64: 128, 128>}, {transform_indices = @transform_2, window_bounds = array<i64: 128, 128>}, {transform_indices = @transform_3, window_bounds = array<i64: 1, 128>}, {transform_indices = @transform_4, window_bounds = array<i64: 8, 128>}]} {
    %c0_i32 = arith.constant 0 : i32
    %0 = arith.cmpi eq, %arg2, %c0_i32 : i32
    %1 = arith.extui %0 : i1 to i32
    %c0_i32_0 = arith.constant 0 : i32
    %2 = arith.cmpi ne, %1, %c0_i32_0 : i32
    scf.if %2 {
      %cst_13 = arith.constant 0.000000e+00 : f32
      %14 = vector.broadcast %cst_13 : f32 to vector<8x128xf32>
      %c0_14 = arith.constant 0 : index
      %c0_15 = arith.constant 0 : index
      %15 = vector.load %arg8[%c0_14, %c0_15] : memref<8x128xf32, #tpu.memory_space<vmem>>, vector<8x128xf32>
      tpu.vector_store %arg8[%c0_14, %c0_15], %14 {strides = array<i32>} : memref<8x128xf32, #tpu.memory_space<vmem>>, vector<8x128xf32>,
    } else {
    }
    %c0 = arith.constant 0 : index
    %c0_1 = arith.constant 0 : index
    %3 = vector.load %arg4[%c0, %c0_1] : memref<128x128xf32, #tpu.memory_space<vmem>>, vector<128x128xf32>
    %c0_2 = arith.constant 0 : index
    %c0_3 = arith.constant 0 : index
    %4 = vector.load %arg5[%c0_2, %c0_3] : memref<128x128xf32, #tpu.memory_space<vmem>>, vector<128x128xf32>
    %cst = arith.constant dense<0.000000e+00> : vector<128x128xf32>
    %5 = tpu.matmul %3, %4, %cst {dimension_numbers = #tpu.dot_dimension_numbers<[1], [0], [0], [1], [0, 0, 1, 1], [], []>} : vector<128x128xf32>, vector<128x128xf32>, vector<128x128xf32> -> vector<128x128xf32>
    %c0_4 = arith.constant 0 : index
    %c0_5 = arith.constant 0 : index
    %6 = vector.load %arg8[%c0_4, %c0_5] : memref<8x128xf32, #tpu.memory_space<vmem>>, vector<8x128xf32>
    %c0_6 = arith.constant 0 : index
    %c0_7 = arith.constant 0 : index
    %7 = vector.load %arg3[%c0_6, %c0_7] : memref<8x128xf32, #tpu.memory_space<vmem>>, vector<8x128xf32>
    %cst_8 = arith.constant dense<0.000000e+00> : vector<8x128xf32>
    %8 = tpu.matmul %7, %5, %cst_8 {dimension_numbers = #tpu.dot_dimension_numbers<[1], [0], [0], [1], [0, 0, 1, 1], [], []>} : vector<8x128xf32>, vector<128x128xf32>, vector<8x128xf32> -> vector<8x128xf32>
    %9 = arith.addf %6, %8 : vector<8x128xf32>
    %c0_9 = arith.constant 0 : index
    %c0_10 = arith.constant 0 : index
    %10 = vector.load %arg8[%c0_9, %c0_10] : memref<8x128xf32, #tpu.memory_space<vmem>>, vector<8x128xf32>
    tpu.vector_store %arg8[%c0_9, %c0_10], %9 {strides = array<i32>} : memref<8x128xf32, #tpu.memory_space<vmem>>, vector<8x128xf32>,
    %c0_i32_11 = arith.constant 0 : i32
    %11 = arith.cmpi eq, %arg2, %c0_i32_11 : i32
    %12 = arith.extui %11 : i1 to i32
    %c0_i32_12 = arith.constant 0 : i32
    %13 = arith.cmpi ne, %12, %c0_i32_12 : i32
    scf.if %13 {
      %c0_13 = arith.constant 0 : index
      %c0_14 = arith.constant 0 : index
      %14 = vector.load %arg8[%c0_13, %c0_14] : memref<8x128xf32, #tpu.memory_space<vmem>>, vector<8x128xf32>
      %c0_15 = arith.constant 0 : index
      %c0_16 = arith.constant 0 : index
      %15 = vector.load %arg6[%c0_15, %c0_16] : memref<1x128xf32, #tpu.memory_space<vmem>>, vector<1x128xf32>
      %16 = vector.broadcast %15 : vector<1x128xf32> to vector<8x128xf32>
      %17 = arith.addf %14, %16 : vector<8x128xf32>
      %cst_17 = arith.constant 0.000000e+00 : f32
      %18 = vector.broadcast %cst_17 : f32 to vector<8x128xf32>
      %19 = arith.maximumf %17, %18 : vector<8x128xf32>
      %c0_18 = arith.constant 0 : index
      %c0_19 = arith.constant 0 : index
      %20 = vector.load %arg7[%c0_18, %c0_19] : memref<8x128xf32, #tpu.memory_space<vmem>>, vector<8x128xf32>
      tpu.vector_store %arg7[%c0_18, %c0_19], %19 {strides = array<i32>} : memref<8x128xf32, #tpu.memory_space<vmem>>, vector<8x128xf32>,
    } else {
    }
    return
  }
  func.func @transform_0(%arg0: i32, %arg1: i32, %arg2: i32) -> (i32, i32) {
    %c0_i32 = arith.constant 0 : i32
    return %arg0, %arg2 : i32, i32
  }
  func.func @transform_1(%arg0: i32, %arg1: i32, %arg2: i32) -> (i32, i32) {
    %c0_i32 = arith.constant 0 : i32
    %c0_i32_0 = arith.constant 0 : i32
    return %arg2, %c0_i32 : i32, i32
  }
  func.func @transform_2(%arg0: i32, %arg1: i32, %arg2: i32) -> (i32, i32) {
    %c0_i32 = arith.constant 0 : i32
    %c0_i32_0 = arith.constant 0 : i32
    return %c0_i32, %arg1 : i32, i32
  }
  func.func @transform_3(%arg0: i32, %arg1: i32, %arg2: i32) -> (i32, i32) {
    %c0_i32 = arith.constant 0 : i32
    %c0_i32_0 = arith.constant 0 : i32
    return %c0_i32, %arg1 : i32, i32
  }
  func.func @transform_4(%arg0: i32, %arg1: i32, %arg2: i32) -> (i32, i32) {
    %c0_i32 = arith.constant 0 : i32
    return %arg0, %arg1 : i32, i32
  }
}

module attributes {stable_mosaic.version = 11 : i64} {
  func.func @_gcn_kernel(%arg0: i32, %arg1: i32, %arg2: i32, %arg3: memref<8x128xf32, #tpu.memory_space<vmem>>, %arg4: memref<128x128xf32, #tpu.memory_space<vmem>>, %arg5: memref<128x128xf32, #tpu.memory_space<vmem>>, %arg6: memref<1x128xf32, #tpu.memory_space<vmem>>, %arg7: memref<8x128xf32, #tpu.memory_space<vmem>>, %arg8: memref<8x128xf32, #tpu.memory_space<vmem>>) attributes {dimension_semantics = [#tpu.dimension_semantics<parallel>, #tpu.dimension_semantics<parallel>, #tpu.dimension_semantics<arbitrary>], iteration_bounds = array<i64: 1, 1, 1>, scalar_prefetch = 0 : i64, scratch_operands = 1 : i64, tpu.core_type = #tpu.core_type<tc>, window_params = [{transform_indices = @transform_0, window_bounds = array<i64: 8, 128>}, {transform_indices = @transform_1, window_bounds = array<i64: 128, 128>}, {transform_indices = @transform_2, window_bounds = array<i64: 128, 128>}, {transform_indices = @transform_3, window_bounds = array<i64: 1, 128>}, {transform_indices = @transform_4, window_bounds = array<i64: 8, 128>}]} {
    %c0_i32 = arith.constant 0 : i32
    %0 = arith.cmpi eq, %arg2, %c0_i32 : i32
    %1 = arith.extui %0 : i1 to i32
    %c0_i32_0 = arith.constant 0 : i32
    %2 = arith.cmpi ne, %1, %c0_i32_0 : i32
    scf.if %2 {
      %cst_13 = arith.constant 0.000000e+00 : f32
      %14 = vector.broadcast %cst_13 : f32 to vector<8x128xf32>
      %c0_14 = arith.constant 0 : index
      %c0_15 = arith.constant 0 : index
      %15 = vector.load %arg8[%c0_14, %c0_15] : memref<8x128xf32, #tpu.memory_space<vmem>>, vector<8x128xf32>
      tpu.vector_store %arg8[%c0_14, %c0_15], %14 {strides = array<i32>} : memref<8x128xf32, #tpu.memory_space<vmem>>, vector<8x128xf32>,
    } else {
    }
    %c0 = arith.constant 0 : index
    %c0_1 = arith.constant 0 : index
    %3 = vector.load %arg4[%c0, %c0_1] : memref<128x128xf32, #tpu.memory_space<vmem>>, vector<128x128xf32>
    %c0_2 = arith.constant 0 : index
    %c0_3 = arith.constant 0 : index
    %4 = vector.load %arg5[%c0_2, %c0_3] : memref<128x128xf32, #tpu.memory_space<vmem>>, vector<128x128xf32>
    %cst = arith.constant dense<0.000000e+00> : vector<128x128xf32>
    %5 = tpu.matmul %3, %4, %cst {dimension_numbers = #tpu.dot_dimension_numbers<[1], [0], [0], [1], [0, 0, 1, 1], [], []>} : vector<128x128xf32>, vector<128x128xf32>, vector<128x128xf32> -> vector<128x128xf32>
    %c0_4 = arith.constant 0 : index
    %c0_5 = arith.constant 0 : index
    %6 = vector.load %arg8[%c0_4, %c0_5] : memref<8x128xf32, #tpu.memory_space<vmem>>, vector<8x128xf32>
    %c0_6 = arith.constant 0 : index
    %c0_7 = arith.constant 0 : index
    %7 = vector.load %arg3[%c0_6, %c0_7] : memref<8x128xf32, #tpu.memory_space<vmem>>, vector<8x128xf32>
    %cst_8 = arith.constant dense<0.000000e+00> : vector<8x128xf32>
    %8 = tpu.matmul %7, %5, %cst_8 {dimension_numbers = #tpu.dot_dimension_numbers<[1], [0], [0], [1], [0, 0, 1, 1], [], []>} : vector<8x128xf32>, vector<128x128xf32>, vector<8x128xf32> -> vector<8x128xf32>
    %9 = arith.addf %6, %8 : vector<8x128xf32>
    %c0_9 = arith.constant 0 : index
    %c0_10 = arith.constant 0 : index
    %10 = vector.load %arg8[%c0_9, %c0_10] : memref<8x128xf32, #tpu.memory_space<vmem>>, vector<8x128xf32>
    tpu.vector_store %arg8[%c0_9, %c0_10], %9 {strides = array<i32>} : memref<8x128xf32, #tpu.memory_space<vmem>>, vector<8x128xf32>,
    %c0_i32_11 = arith.constant 0 : i32
    %11 = arith.cmpi eq, %arg2, %c0_i32_11 : i32
    %12 = arith.extui %11 : i1 to i32
    %c0_i32_12 = arith.constant 0 : i32
    %13 = arith.cmpi ne, %12, %c0_i32_12 : i32
    scf.if %13 {
      %c0_13 = arith.constant 0 : index
      %c0_14 = arith.constant 0 : index
      %14 = vector.load %arg8[%c0_13, %c0_14] : memref<8x128xf32, #tpu.memory_space<vmem>>, vector<8x128xf32>
      %c0_15 = arith.constant 0 : index
      %c0_16 = arith.constant 0 : index
      %15 = vector.load %arg6[%c0_15, %c0_16] : memref<1x128xf32, #tpu.memory_space<vmem>>, vector<1x128xf32>
      %16 = vector.broadcast %15 : vector<1x128xf32> to vector<8x128xf32>
      %17 = arith.addf %14, %16 : vector<8x128xf32>
      %c0_17 = arith.constant 0 : index
      %c0_18 = arith.constant 0 : index
      %18 = vector.load %arg7[%c0_17, %c0_18] : memref<8x128xf32, #tpu.memory_space<vmem>>, vector<8x128xf32>
      tpu.vector_store %arg7[%c0_17, %c0_18], %17 {strides = array<i32>} : memref<8x128xf32, #tpu.memory_space<vmem>>, vector<8x128xf32>,
    } else {
    }
    return
  }
  func.func @transform_0(%arg0: i32, %arg1: i32, %arg2: i32) -> (i32, i32) {
    %c0_i32 = arith.constant 0 : i32
    return %arg0, %arg2 : i32, i32
  }
  func.func @transform_1(%arg0: i32, %arg1: i32, %arg2: i32) -> (i32, i32) {
    %c0_i32 = arith.constant 0 : i32
    %c0_i32_0 = arith.constant 0 : i32
    return %arg2, %c0_i32 : i32, i32
  }
  func.func @transform_2(%arg0: i32, %arg1: i32, %arg2: i32) -> (i32, i32) {
    %c0_i32 = arith.constant 0 : i32
    %c0_i32_0 = arith.constant 0 : i32
    return %c0_i32, %arg1 : i32, i32
  }
  func.func @transform_3(%arg0: i32, %arg1: i32, %arg2: i32) -> (i32, i32) {
    %c0_i32 = arith.constant 0 : i32
    %c0_i32_0 = arith.constant 0 : i32
    return %c0_i32, %arg1 : i32, i32
  }
  func.func @transform_4(%arg0: i32, %arg1: i32, %arg2: i32) -> (i32, i32) {
    %c0_i32 = arith.constant 0 : i32
    return %arg0, %arg1 : i32, i32
  }
}

module attributes {stable_mosaic.version = 11 : i64} {
  func.func @_matmul_kernel(%arg0: i32, %arg1: i32, %arg2: i32, %arg3: memref<8x128xf32, #tpu.memory_space<vmem>>, %arg4: memref<128x128xf32, #tpu.memory_space<vmem>>, %arg5: memref<1x128xf32, #tpu.memory_space<vmem>>, %arg6: memref<8x128xf32, #tpu.memory_space<vmem>>, %arg7: memref<8x128xf32, #tpu.memory_space<vmem>>) attributes {dimension_semantics = [#tpu.dimension_semantics<parallel>, #tpu.dimension_semantics<parallel>, #tpu.dimension_semantics<arbitrary>], iteration_bounds = array<i64: 1, 1, 1>, scalar_prefetch = 0 : i64, scratch_operands = 1 : i64, tpu.core_type = #tpu.core_type<tc>, window_params = [{transform_indices = @transform_0, window_bounds = array<i64: 8, 128>}, {transform_indices = @transform_1, window_bounds = array<i64: 128, 128>}, {transform_indices = @transform_2, window_bounds = array<i64: 1, 128>}, {transform_indices = @transform_3, window_bounds = array<i64: 8, 128>}]} {
    %c0_i32 = arith.constant 0 : i32
    %0 = arith.cmpi eq, %arg2, %c0_i32 : i32
    %1 = arith.extui %0 : i1 to i32
    %c0_i32_0 = arith.constant 0 : i32
    %2 = arith.cmpi ne, %1, %c0_i32_0 : i32
    scf.if %2 {
      %cst_10 = arith.constant 0.000000e+00 : f32
      %12 = vector.broadcast %cst_10 : f32 to vector<8x128xf32>
      %c0_11 = arith.constant 0 : index
      %c0_12 = arith.constant 0 : index
      %13 = vector.load %arg7[%c0_11, %c0_12] : memref<8x128xf32, #tpu.memory_space<vmem>>, vector<8x128xf32>
      tpu.vector_store %arg7[%c0_11, %c0_12], %12 {strides = array<i32>} : memref<8x128xf32, #tpu.memory_space<vmem>>, vector<8x128xf32>,
    } else {
    }
    %c0 = arith.constant 0 : index
    %c0_1 = arith.constant 0 : index
    %3 = vector.load %arg7[%c0, %c0_1] : memref<8x128xf32, #tpu.memory_space<vmem>>, vector<8x128xf32>
    %c0_2 = arith.constant 0 : index
    %c0_3 = arith.constant 0 : index
    %4 = vector.load %arg3[%c0_2, %c0_3] : memref<8x128xf32, #tpu.memory_space<vmem>>, vector<8x128xf32>
    %c0_4 = arith.constant 0 : index
    %c0_5 = arith.constant 0 : index
    %5 = vector.load %arg4[%c0_4, %c0_5] : memref<128x128xf32, #tpu.memory_space<vmem>>, vector<128x128xf32>
    %cst = arith.constant dense<0.000000e+00> : vector<8x128xf32>
    %6 = tpu.matmul %4, %5, %cst {dimension_numbers = #tpu.dot_dimension_numbers<[1], [0], [0], [1], [0, 0, 1, 1], [], []>} : vector<8x128xf32>, vector<128x128xf32>, vector<8x128xf32> -> vector<8x128xf32>
    %7 = arith.addf %3, %6 : vector<8x128xf32>
    %c0_6 = arith.constant 0 : index
    %c0_7 = arith.constant 0 : index
    %8 = vector.load %arg7[%c0_6, %c0_7] : memref<8x128xf32, #tpu.memory_space<vmem>>, vector<8x128xf32>
    tpu.vector_store %arg7[%c0_6, %c0_7], %7 {strides = array<i32>} : memref<8x128xf32, #tpu.memory_space<vmem>>, vector<8x128xf32>,
    %c0_i32_8 = arith.constant 0 : i32
    %9 = arith.cmpi eq, %arg2, %c0_i32_8 : i32
    %10 = arith.extui %9 : i1 to i32
    %c0_i32_9 = arith.constant 0 : i32
    %11 = arith.cmpi ne, %10, %c0_i32_9 : i32
    scf.if %11 {
      %c0_10 = arith.constant 0 : index
      %c0_11 = arith.constant 0 : index
      %12 = vector.load %arg7[%c0_10, %c0_11] : memref<8x128xf32, #tpu.memory_space<vmem>>, vector<8x128xf32>
      %c0_12 = arith.constant 0 : index
      %c0_13 = arith.constant 0 : index
      %13 = vector.load %arg5[%c0_12, %c0_13] : memref<1x128xf32, #tpu.memory_space<vmem>>, vector<1x128xf32>
      %14 = vector.broadcast %13 : vector<1x128xf32> to vector<8x128xf32>
      %15 = arith.addf %12, %14 : vector<8x128xf32>
      %cst_14 = arith.constant 0.000000e+00 : f32
      %16 = vector.broadcast %cst_14 : f32 to vector<8x128xf32>
      %17 = arith.maximumf %15, %16 : vector<8x128xf32>
      %c0_15 = arith.constant 0 : index
      %c0_16 = arith.constant 0 : index
      %18 = vector.load %arg6[%c0_15, %c0_16] : memref<8x128xf32, #tpu.memory_space<vmem>>, vector<8x128xf32>
      tpu.vector_store %arg6[%c0_15, %c0_16], %17 {strides = array<i32>} : memref<8x128xf32, #tpu.memory_space<vmem>>, vector<8x128xf32>,
    } else {
    }
    return
  }
  func.func @transform_0(%arg0: i32, %arg1: i32, %arg2: i32) -> (i32, i32) {
    %c0_i32 = arith.constant 0 : i32
    return %arg0, %arg2 : i32, i32
  }
  func.func @transform_1(%arg0: i32, %arg1: i32, %arg2: i32) -> (i32, i32) {
    %c0_i32 = arith.constant 0 : i32
    return %arg2, %arg1 : i32, i32
  }
  func.func @transform_2(%arg0: i32, %arg1: i32, %arg2: i32) -> (i32, i32) {
    %c0_i32 = arith.constant 0 : i32
    %c0_i32_0 = arith.constant 0 : i32
    return %c0_i32, %arg1 : i32, i32
  }
  func.func @transform_3(%arg0: i32, %arg1: i32, %arg2: i32) -> (i32, i32) {
    %c0_i32 = arith.constant 0 : i32
    return %arg0, %arg1 : i32, i32
  }
}

module attributes {stable_mosaic.version = 11 : i64} {
  func.func @_matmul_kernel(%arg0: i32, %arg1: i32, %arg2: i32, %arg3: memref<8x128xf32, #tpu.memory_space<vmem>>, %arg4: memref<128x128xf32, #tpu.memory_space<vmem>>, %arg5: memref<1x128xf32, #tpu.memory_space<vmem>>, %arg6: memref<8x128xf32, #tpu.memory_space<vmem>>, %arg7: memref<8x128xf32, #tpu.memory_space<vmem>>) attributes {dimension_semantics = [#tpu.dimension_semantics<parallel>, #tpu.dimension_semantics<parallel>, #tpu.dimension_semantics<arbitrary>], iteration_bounds = array<i64: 1, 1, 1>, scalar_prefetch = 0 : i64, scratch_operands = 1 : i64, tpu.core_type = #tpu.core_type<tc>, window_params = [{transform_indices = @transform_0, window_bounds = array<i64: 8, 128>}, {transform_indices = @transform_1, window_bounds = array<i64: 128, 128>}, {transform_indices = @transform_2, window_bounds = array<i64: 1, 128>}, {transform_indices = @transform_3, window_bounds = array<i64: 8, 128>}]} {
    %c0_i32 = arith.constant 0 : i32
    %0 = arith.cmpi eq, %arg2, %c0_i32 : i32
    %1 = arith.extui %0 : i1 to i32
    %c0_i32_0 = arith.constant 0 : i32
    %2 = arith.cmpi ne, %1, %c0_i32_0 : i32
    scf.if %2 {
      %cst_10 = arith.constant 0.000000e+00 : f32
      %12 = vector.broadcast %cst_10 : f32 to vector<8x128xf32>
      %c0_11 = arith.constant 0 : index
      %c0_12 = arith.constant 0 : index
      %13 = vector.load %arg7[%c0_11, %c0_12] : memref<8x128xf32, #tpu.memory_space<vmem>>, vector<8x128xf32>
      tpu.vector_store %arg7[%c0_11, %c0_12], %12 {strides = array<i32>} : memref<8x128xf32, #tpu.memory_space<vmem>>, vector<8x128xf32>,
    } else {
    }
    %c0 = arith.constant 0 : index
    %c0_1 = arith.constant 0 : index
    %3 = vector.load %arg7[%c0, %c0_1] : memref<8x128xf32, #tpu.memory_space<vmem>>, vector<8x128xf32>
    %c0_2 = arith.constant 0 : index
    %c0_3 = arith.constant 0 : index
    %4 = vector.load %arg3[%c0_2, %c0_3] : memref<8x128xf32, #tpu.memory_space<vmem>>, vector<8x128xf32>
    %c0_4 = arith.constant 0 : index
    %c0_5 = arith.constant 0 : index
    %5 = vector.load %arg4[%c0_4, %c0_5] : memref<128x128xf32, #tpu.memory_space<vmem>>, vector<128x128xf32>
    %cst = arith.constant dense<0.000000e+00> : vector<8x128xf32>
    %6 = tpu.matmul %4, %5, %cst {dimension_numbers = #tpu.dot_dimension_numbers<[1], [0], [0], [1], [0, 0, 1, 1], [], []>} : vector<8x128xf32>, vector<128x128xf32>, vector<8x128xf32> -> vector<8x128xf32>
    %7 = arith.addf %3, %6 : vector<8x128xf32>
    %c0_6 = arith.constant 0 : index
    %c0_7 = arith.constant 0 : index
    %8 = vector.load %arg7[%c0_6, %c0_7] : memref<8x128xf32, #tpu.memory_space<vmem>>, vector<8x128xf32>
    tpu.vector_store %arg7[%c0_6, %c0_7], %7 {strides = array<i32>} : memref<8x128xf32, #tpu.memory_space<vmem>>, vector<8x128xf32>,
    %c0_i32_8 = arith.constant 0 : i32
    %9 = arith.cmpi eq, %arg2, %c0_i32_8 : i32
    %10 = arith.extui %9 : i1 to i32
    %c0_i32_9 = arith.constant 0 : i32
    %11 = arith.cmpi ne, %10, %c0_i32_9 : i32
    scf.if %11 {
      %c0_10 = arith.constant 0 : index
      %c0_11 = arith.constant 0 : index
      %12 = vector.load %arg7[%c0_10, %c0_11] : memref<8x128xf32, #tpu.memory_space<vmem>>, vector<8x128xf32>
      %c0_12 = arith.constant 0 : index
      %c0_13 = arith.constant 0 : index
      %13 = vector.load %arg5[%c0_12, %c0_13] : memref<1x128xf32, #tpu.memory_space<vmem>>, vector<1x128xf32>
      %14 = vector.broadcast %13 : vector<1x128xf32> to vector<8x128xf32>
      %15 = arith.addf %12, %14 : vector<8x128xf32>
      %c0_14 = arith.constant 0 : index
      %c0_15 = arith.constant 0 : index
      %16 = vector.load %arg6[%c0_14, %c0_15] : memref<8x128xf32, #tpu.memory_space<vmem>>, vector<8x128xf32>
      tpu.vector_store %arg6[%c0_14, %c0_15], %15 {strides = array<i32>} : memref<8x128xf32, #tpu.memory_space<vmem>>, vector<8x128xf32>,
    } else {
    }
    return
  }
  func.func @transform_0(%arg0: i32, %arg1: i32, %arg2: i32) -> (i32, i32) {
    %c0_i32 = arith.constant 0 : i32
    return %arg0, %arg2 : i32, i32
  }
  func.func @transform_1(%arg0: i32, %arg1: i32, %arg2: i32) -> (i32, i32) {
    %c0_i32 = arith.constant 0 : i32
    return %arg2, %arg1 : i32, i32
  }
  func.func @transform_2(%arg0: i32, %arg1: i32, %arg2: i32) -> (i32, i32) {
    %c0_i32 = arith.constant 0 : i32
    %c0_i32_0 = arith.constant 0 : i32
    return %c0_i32, %arg1 : i32, i32
  }
  func.func @transform_3(%arg0: i32, %arg1: i32, %arg2: i32) -> (i32, i32) {
    %c0_i32 = arith.constant 0 : i32
    return %arg0, %arg1 : i32, i32
  }
}

module attributes {stable_mosaic.version = 11 : i64} {
  func.func @_matmul_kernel(%arg0: i32, %arg1: i32, %arg2: i32, %arg3: memref<8x128xf32, #tpu.memory_space<vmem>>, %arg4: memref<128x128xf32, #tpu.memory_space<vmem>>, %arg5: memref<1x128xf32, #tpu.memory_space<vmem>>, %arg6: memref<8x128xf32, #tpu.memory_space<vmem>>, %arg7: memref<8x128xf32, #tpu.memory_space<vmem>>) attributes {dimension_semantics = [#tpu.dimension_semantics<parallel>, #tpu.dimension_semantics<parallel>, #tpu.dimension_semantics<arbitrary>], iteration_bounds = array<i64: 1, 1, 1>, scalar_prefetch = 0 : i64, scratch_operands = 1 : i64, tpu.core_type = #tpu.core_type<tc>, window_params = [{transform_indices = @transform_0, window_bounds = array<i64: 8, 128>}, {transform_indices = @transform_1, window_bounds = array<i64: 128, 128>}, {transform_indices = @transform_2, window_bounds = array<i64: 1, 128>}, {transform_indices = @transform_3, window_bounds = array<i64: 8, 128>}]} {
    %c0_i32 = arith.constant 0 : i32
    %0 = arith.cmpi eq, %arg2, %c0_i32 : i32
    %1 = arith.extui %0 : i1 to i32
    %c0_i32_0 = arith.constant 0 : i32
    %2 = arith.cmpi ne, %1, %c0_i32_0 : i32
    scf.if %2 {
      %cst_10 = arith.constant 0.000000e+00 : f32
      %12 = vector.broadcast %cst_10 : f32 to vector<8x128xf32>
      %c0_11 = arith.constant 0 : index
      %c0_12 = arith.constant 0 : index
      %13 = vector.load %arg7[%c0_11, %c0_12] : memref<8x128xf32, #tpu.memory_space<vmem>>, vector<8x128xf32>
      tpu.vector_store %arg7[%c0_11, %c0_12], %12 {strides = array<i32>} : memref<8x128xf32, #tpu.memory_space<vmem>>, vector<8x128xf32>,
    } else {
    }
    %c0 = arith.constant 0 : index
    %c0_1 = arith.constant 0 : index
    %3 = vector.load %arg7[%c0, %c0_1] : memref<8x128xf32, #tpu.memory_space<vmem>>, vector<8x128xf32>
    %c0_2 = arith.constant 0 : index
    %c0_3 = arith.constant 0 : index
    %4 = vector.load %arg3[%c0_2, %c0_3] : memref<8x128xf32, #tpu.memory_space<vmem>>, vector<8x128xf32>
    %c0_4 = arith.constant 0 : index
    %c0_5 = arith.constant 0 : index
    %5 = vector.load %arg4[%c0_4, %c0_5] : memref<128x128xf32, #tpu.memory_space<vmem>>, vector<128x128xf32>
    %cst = arith.constant dense<0.000000e+00> : vector<8x128xf32>
    %6 = tpu.matmul %4, %5, %cst {dimension_numbers = #tpu.dot_dimension_numbers<[1], [0], [0], [1], [0, 0, 1, 1], [], []>} : vector<8x128xf32>, vector<128x128xf32>, vector<8x128xf32> -> vector<8x128xf32>
    %7 = arith.addf %3, %6 : vector<8x128xf32>
    %c0_6 = arith.constant 0 : index
    %c0_7 = arith.constant 0 : index
    %8 = vector.load %arg7[%c0_6, %c0_7] : memref<8x128xf32, #tpu.memory_space<vmem>>, vector<8x128xf32>
    tpu.vector_store %arg7[%c0_6, %c0_7], %7 {strides = array<i32>} : memref<8x128xf32, #tpu.memory_space<vmem>>, vector<8x128xf32>,
    %c0_i32_8 = arith.constant 0 : i32
    %9 = arith.cmpi eq, %arg2, %c0_i32_8 : i32
    %10 = arith.extui %9 : i1 to i32
    %c0_i32_9 = arith.constant 0 : i32
    %11 = arith.cmpi ne, %10, %c0_i32_9 : i32
    scf.if %11 {
      %c0_10 = arith.constant 0 : index
      %c0_11 = arith.constant 0 : index
      %12 = vector.load %arg7[%c0_10, %c0_11] : memref<8x128xf32, #tpu.memory_space<vmem>>, vector<8x128xf32>
      %c0_12 = arith.constant 0 : index
      %c0_13 = arith.constant 0 : index
      %13 = vector.load %arg5[%c0_12, %c0_13] : memref<1x128xf32, #tpu.memory_space<vmem>>, vector<1x128xf32>
      %14 = vector.broadcast %13 : vector<1x128xf32> to vector<8x128xf32>
      %15 = arith.addf %12, %14 : vector<8x128xf32>
      %16 = arith.negf %15 : vector<8x128xf32>
      %17 = math.exp %16 : vector<8x128xf32>
      %cst_14 = arith.constant 1.000000e+00 : f32
      %18 = vector.broadcast %cst_14 : f32 to vector<8x128xf32>
      %19 = arith.addf %18, %17 : vector<8x128xf32>
      %20 = arith.divf %18, %19 : vector<8x128xf32>
      %c0_15 = arith.constant 0 : index
      %c0_16 = arith.constant 0 : index
      %21 = vector.load %arg6[%c0_15, %c0_16] : memref<8x128xf32, #tpu.memory_space<vmem>>, vector<8x128xf32>
      tpu.vector_store %arg6[%c0_15, %c0_16], %20 {strides = array<i32>} : memref<8x128xf32, #tpu.memory_space<vmem>>, vector<8x128xf32>,
    } else {
    }
    return
  }
  func.func @transform_0(%arg0: i32, %arg1: i32, %arg2: i32) -> (i32, i32) {
    %c0_i32 = arith.constant 0 : i32
    return %arg0, %arg2 : i32, i32
  }
  func.func @transform_1(%arg0: i32, %arg1: i32, %arg2: i32) -> (i32, i32) {
    %c0_i32 = arith.constant 0 : i32
    return %arg2, %arg1 : i32, i32
  }
  func.func @transform_2(%arg0: i32, %arg1: i32, %arg2: i32) -> (i32, i32) {
    %c0_i32 = arith.constant 0 : i32
    %c0_i32_0 = arith.constant 0 : i32
    return %c0_i32, %arg1 : i32, i32
  }
  func.func @transform_3(%arg0: i32, %arg1: i32, %arg2: i32) -> (i32, i32) {
    %c0_i32 = arith.constant 0 : i32
    return %arg0, %arg1 : i32, i32
  }
}

</mosaic_0001>

<bundles_post_ra>
// kernel: vsepacat_forward.10
= control target key start
LH: loop header
LB: loop body
LE: loop exit
PB: predicated region body
PF: predicated region fallthrough
CT: control target
= control target key end

     0   :  { %v206_v0 = vmov 0.0|0.0   ;;  %vm207_vm0 = vmmov 0   ;;  %v208_v4 = vmov 0.0   ;;  %s286_s1 = inlined_call_operand.vmem [shape: f32[128,128], index: 1, kind: input, shape index: {}]   ;;  %s287_s0 = inlined_call_operand.vmem [shape: f32[8,128], index: 0, kind: input, shape index: {}]   ;;  %s288_s2 = inlined_call_operand.vmem [shape: f32[1,128], index: 2, kind: input, shape index: {}]   ;;  %s289_s3 = inlined_call_operand.vmem [shape: f32[8,128], index: 3, kind: output, shape index: {}]  }
   0x1   :  { %179 = vmatprep.subr.bf16.mxu0 %v206_v0  ;;  %v21_v1 = vld [vmem:[%s286_s1] sm:$0xff]  ;;  %v22_v2 = vld [vmem:[%s286_s1 + $0x8] sm:$0xff]  ;;  %v23_v3 = vld [vmem:[%s286_s1 + $0x10] sm:$0xff]  ;;  %176 = vmatprep.mubr.msk.f32.mxu0 %vm207_vm0, %v208_v4 }
   0x2   :  { %v180_v5 = vpack.c.bf16 %v22_v2, %v21_v1  ;;  %v24_v6 = vld [vmem:[%s286_s1 + $0x18] sm:$0xff]  ;;  %v25_v8 = vld [vmem:[%s286_s1 + $0x20] sm:$0xff]  ;;  %v26_v9 = vld [vmem:[%s286_s1 + $0x28] sm:$0xff] }
   0x3   :  { %v183_v7 = vpack.c.bf16 %v24_v6, %v23_v3  ;;  %v186_v10 = vpack.c.bf16 %v26_v9, %v25_v8  ;;  %v27_v11 = vld [vmem:[%s286_s1 + $0x30] sm:$0xff]  ;;  %v28_v12 = vld [vmem:[%s286_s1 + $0x38] sm:$0xff]  ;;  %v29_v14 = vld [vmem:[%s286_s1 + $0x40] sm:$0xff] }
   0x4   :  { %181 = vmatpush3.bf16.msra.mxu0 %v180_v5  ;;  %v189_v13 = vpack.c.bf16 %v28_v12, %v27_v11  ;;  %v30_v15 = vld [vmem:[%s286_s1 + $0x48] sm:$0xff]  ;;  %v31_v17 = vld [vmem:[%s286_s1 + $0x50] sm:$0xff]  ;;  %v32_v18 = vld [vmem:[%s286_s1 + $0x58] sm:$0xff] }
   0x5   :  { %182 = vmatprep.subr.bf16.mxu0 %v206_v0  ;;  %v192_v16 = vpack.c.bf16 %v30_v15, %v29_v14  ;;  %v195_v19 = vpack.c.bf16 %v32_v18, %v31_v17  ;;  %v33_v20 = vld [vmem:[%s286_s1 + $0x60] sm:$0xff]  ;;  %v34_v21 = vld [vmem:[%s286_s1 + $0x68] sm:$0xff]  ;;  %v35_v23 = vld [vmem:[%s286_s1 + $0x70] sm:$0xff] }
   0x6   :  { %v198_v22 = vpack.c.bf16 %v34_v21, %v33_v20  ;;  %v36_v24 = vld [vmem:[%s286_s1 + $0x78] sm:$0xff]  ;;  %v20_v26 = vld [vmem:[%s287_s0] sm:$0xff] }
   0x7   :  { %v201_v25 = vpack.c.bf16 %v36_v24, %v35_v23  ;;  %v126_v27 = vld [vmem:[%s288_s2] ss:$0 sm:$0xff] }
   0x8   :  { %184 = vmatpush3.bf16.msra.mxu0 %v183_v7 }
   0x9   :  { %185 = vmatprep.subr.bf16.mxu0 %v206_v0 }
   0xc   :  { %187 = vmatpush3.bf16.msra.mxu0 %v186_v10 }
   0xd   :  { %188 = vmatprep.subr.bf16.mxu0 %v206_v0 }
  0x10   :  { %190 = vmatpush3.bf16.msra.mxu0 %v189_v13 }
  0x11   :  { %191 = vmatprep.subr.bf16.mxu0 %v206_v0 }
  0x14   :  { %193 = vmatpush3.bf16.msra.mxu0 %v192_v16 }
  0x15   :  { %194 = vmatprep.subr.bf16.mxu0 %v206_v0 }
  0x18   :  { %196 = vmatpush3.bf16.msra.mxu0 %v195_v19 }
  0x19   :  { %197 = vmatprep.subr.bf16.mxu0 %v206_v0 }
  0x1c   :  { %199 = vmatpush3.bf16.msra.mxu0 %v198_v22 }
  0x1d   :  { %200 = vmatprep.subr.bf16.mxu0 %v206_v0 }
  0x20   :  { %202 = vmatpush3.bf16.msra.mxu0 %v201_v25 }
  0x23   :  { %177 = vmatmul.mubr.f32.vlgmr.msra.gmra.mrb[0].mxu0 %v20_v26 }
  0xf6   :  { %v103_v28 = vpop.f32.mrb[0].mxu0 }
  0xf7   :  { %v120_v29 = vadd.f32 %v126_v27, %v103_v28  ;;  %v178_v30 = vpop.f32.mrb[1].mxu0 }
  0xf9   :  { %121 = vst [vmem:[%s289_s3] sm:$0xff] %v120_v29 }

// kernel: vsepacat_forward.9
= control target key start
LH: loop header
LB: loop body
LE: loop exit
PB: predicated region body
PF: predicated region fallthrough
CT: control target
= control target key end

     0   :  { %v207_v0 = vmov 0.0|0.0   ;;  %vm208_vm0 = vmmov 0   ;;  %v209_v4 = vmov 0.0   ;;  %s287_s1 = inlined_call_operand.vmem [shape: f32[128,128], index: 1, kind: input, shape index: {}]   ;;  %s288_s0 = inlined_call_operand.vmem [shape: f32[8,128], index: 0, kind: input, shape index: {}]   ;;  %s289_s2 = inlined_call_operand.vmem [shape: f32[1,128], index: 2, kind: input, shape index: {}]   ;;  %s290_s3 = inlined_call_operand.vmem [shape: f32[8,128], index: 3, kind: output, shape index: {}]  }
   0x1   :  { %180 = vmatprep.subr.bf16.mxu0 %v207_v0  ;;  %v21_v1 = vld [vmem:[%s287_s1] sm:$0xff]  ;;  %v22_v2 = vld [vmem:[%s287_s1 + $0x8] sm:$0xff]  ;;  %v23_v3 = vld [vmem:[%s287_s1 + $0x10] sm:$0xff]  ;;  %177 = vmatprep.mubr.msk.f32.mxu0 %vm208_vm0, %v209_v4 }
   0x2   :  { %v181_v5 = vpack.c.bf16 %v22_v2, %v21_v1  ;;  %v24_v6 = vld [vmem:[%s287_s1 + $0x18] sm:$0xff]  ;;  %v25_v8 = vld [vmem:[%s287_s1 + $0x20] sm:$0xff]  ;;  %v26_v9 = vld [vmem:[%s287_s1 + $0x28] sm:$0xff] }
   0x3   :  { %v184_v7 = vpack.c.bf16 %v24_v6, %v23_v3  ;;  %v187_v10 = vpack.c.bf16 %v26_v9, %v25_v8  ;;  %v27_v11 = vld [vmem:[%s287_s1 + $0x30] sm:$0xff]  ;;  %v28_v12 = vld [vmem:[%s287_s1 + $0x38] sm:$0xff]  ;;  %v29_v14 = vld [vmem:[%s287_s1 + $0x40] sm:$0xff] }
   0x4   :  { %182 = vmatpush3.bf16.msra.mxu0 %v181_v5  ;;  %v190_v13 = vpack.c.bf16 %v28_v12, %v27_v11  ;;  %v30_v15 = vld [vmem:[%s287_s1 + $0x48] sm:$0xff]  ;;  %v31_v17 = vld [vmem:[%s287_s1 + $0x50] sm:$0xff]  ;;  %v32_v18 = vld [vmem:[%s287_s1 + $0x58] sm:$0xff] }
   0x5   :  { %183 = vmatprep.subr.bf16.mxu0 %v207_v0  ;;  %v193_v16 = vpack.c.bf16 %v30_v15, %v29_v14  ;;  %v196_v19 = vpack.c.bf16 %v32_v18, %v31_v17  ;;  %v33_v20 = vld [vmem:[%s287_s1 + $0x60] sm:$0xff]  ;;  %v34_v21 = vld [vmem:[%s287_s1 + $0x68] sm:$0xff]  ;;  %v35_v23 = vld [vmem:[%s287_s1 + $0x70] sm:$0xff] }
   0x6   :  { %v199_v22 = vpack.c.bf16 %v34_v21, %v33_v20  ;;  %v36_v24 = vld [vmem:[%s287_s1 + $0x78] sm:$0xff]  ;;  %v20_v26 = vld [vmem:[%s288_s0] sm:$0xff] }
   0x7   :  { %v202_v25 = vpack.c.bf16 %v36_v24, %v35_v23  ;;  %v127_v27 = vld [vmem:[%s289_s2] ss:$0 sm:$0xff] }
   0x8   :  { %185 = vmatpush3.bf16.msra.mxu0 %v184_v7 }
   0x9   :  { %186 = vmatprep.subr.bf16.mxu0 %v207_v0 }
   0xc   :  { %188 = vmatpush3.bf16.msra.mxu0 %v187_v10 }
   0xd   :  { %189 = vmatprep.subr.bf16.mxu0 %v207_v0 }
  0x10   :  { %191 = vmatpush3.bf16.msra.mxu0 %v190_v13 }
  0x11   :  { %192 = vmatprep.subr.bf16.mxu0 %v207_v0 }
  0x14   :  { %194 = vmatpush3.bf16.msra.mxu0 %v193_v16 }
  0x15   :  { %195 = vmatprep.subr.bf16.mxu0 %v207_v0 }
  0x18   :  { %197 = vmatpush3.bf16.msra.mxu0 %v196_v19 }
  0x19   :  { %198 = vmatprep.subr.bf16.mxu0 %v207_v0 }
  0x1c   :  { %200 = vmatpush3.bf16.msra.mxu0 %v199_v22 }
  0x1d   :  { %201 = vmatprep.subr.bf16.mxu0 %v207_v0 }
  0x20   :  { %203 = vmatpush3.bf16.msra.mxu0 %v202_v25 }
  0x23   :  { %178 = vmatmul.mubr.f32.vlgmr.msra.gmra.mrb[0].mxu0 %v20_v26 }
  0xf6   :  { %v103_v28 = vpop.f32.mrb[0].mxu0 }
  0xf7   :  { %v120_v29 = vadd.f32 %v127_v27, %v103_v28  ;;  %v179_v30 = vpop.f32.mrb[1].mxu0 }
  0xf9   :  { %v121_v31 = vmax.f32 %v120_v29, 0.0 }
  0xfb   :  { %122 = vst [vmem:[%s290_s3] sm:$0xff] %v121_v31 }

// kernel: vsepacat_forward.7
= control target key start
LH: loop header
LB: loop body
LE: loop exit
PB: predicated region body
PF: predicated region fallthrough
CT: control target
= control target key end

     0   :  { %v491_v40 = vmov 0.0|0.0   ;;  %vm492_vm0 = vmmov 0   ;;  %v493_v41 = vmov 0.0   ;;  %s624_s2 = inlined_call_operand.vmem [shape: f32[128,128], index: 2, kind: input, shape index: {}]   ;;  %s625_s1 = inlined_call_operand.vmem [shape: f32[128,128], index: 1, kind: input, shape index: {}]   ;;  %s626_s0 = inlined_call_operand.vmem [shape: f32[8,128], index: 0, kind: input, shape index: {}]   ;;  %s627_s3 = inlined_call_operand.vmem [shape: f32[1,128], index: 3, kind: input, shape index: {}]   ;;  %s628_s4 = inlined_call_operand.vmem [shape: f32[8,128], index: 4, kind: output, shape index: {}]  }
   0x1   :  { %v38_v0 = vld [vmem:[%s624_s2] sm:$0xff]  ;;  %v39_v1 = vld [vmem:[%s624_s2 + $0x8] sm:$0xff]  ;;  %v40_v2 = vld [vmem:[%s624_s2 + $0x10] sm:$0xff]  ;;  %464 = vmatprep.subr.bf16.mxu1 %v491_v40  ;;  %429 = vmatprep.mubr.msk.f32.mxu1 %vm492_vm0, %v493_v41 }
   0x2   :  { %v432_v3 = vpack.c.bf16 %v39_v1, %v38_v0  ;;  %v41_v4 = vld [vmem:[%s624_s2 + $0x18] sm:$0xff]  ;;  %v42_v6 = vld [vmem:[%s624_s2 + $0x20] sm:$0xff]  ;;  %v43_v7 = vld [vmem:[%s624_s2 + $0x28] sm:$0xff] }
   0x3   :  { %v436_v5 = vpack.c.bf16 %v41_v4, %v40_v2  ;;  %v440_v8 = vpack.c.bf16 %v43_v7, %v42_v6  ;;  %v22_v9 = vld [vmem:[%s625_s1] sm:$0xff]  ;;  %v44_v10 = vld [vmem:[%s624_s2 + $0x30] sm:$0xff]  ;;  %v45_v11 = vld [vmem:[%s624_s2 + $0x38] sm:$0xff] }
   0x4   :  { %433 = vmatprep.subr.bf16.mxu0 %v432_v3  ;;  %373 = vmatprep.mubr.f32.mxu0 %v22_v9  ;;  %v444_v12 = vpack.c.bf16 %v45_v11, %v44_v10  ;;  %v46_v13 = vld [vmem:[%s624_s2 + $0x40] sm:$0xff]  ;;  %v47_v14 = vld [vmem:[%s624_s2 + $0x48] sm:$0xff]  ;;  %v48_v16 = vld [vmem:[%s624_s2 + $0x50] sm:$0xff] }
   0x5   :  { %435 = vmatpush3.bf16.msra.mxu0 %v432_v3  ;;  %v448_v15 = vpack.c.bf16 %v47_v14, %v46_v13  ;;  %v49_v17 = vld [vmem:[%s624_s2 + $0x58] sm:$0xff]  ;;  %v50_v19 = vld [vmem:[%s624_s2 + $0x60] sm:$0xff]  ;;  %v51_v20 = vld [vmem:[%s624_s2 + $0x68] sm:$0xff] }
   0x6   :  { %437 = vmatprep.subr.bf16.mxu0 %v436_v5  ;;  %v452_v18 = vpack.c.bf16 %v49_v17, %v48_v16  ;;  %v456_v21 = vpack.c.bf16 %v51_v20, %v50_v19  ;;  %v52_v22 = vld [vmem:[%s624_s2 + $0x70] sm:$0xff]  ;;  %v53_v23 = vld [vmem:[%s624_s2 + $0x78] sm:$0xff]  ;;  %v23_v25 = vld [vmem:[%s625_s1 + $0x8] sm:$0xff] }
   0x7   :  { %v460_v24 = vpack.c.bf16 %v53_v23, %v52_v22  ;;  %v24_v26 = vld [vmem:[%s625_s1 + $0x10] sm:$0xff]  ;;  %v25_v27 = vld [vmem:[%s625_s1 + $0x18] sm:$0xff]  ;;  %v26_v28 = vld [vmem:[%s625_s1 + $0x20] sm:$0xff] }
   0x8   :  { %v27_v29 = vld [vmem:[%s625_s1 + $0x28] sm:$0xff]  ;;  %v28_v30 = vld [vmem:[%s625_s1 + $0x30] sm:$0xff]  ;;  %v29_v31 = vld [vmem:[%s625_s1 + $0x38] sm:$0xff] }
   0x9   :  { %439 = vmatpush3.bf16.msra.mxu0 %v436_v5  ;;  %v30_v32 = vld [vmem:[%s625_s1 + $0x40] sm:$0xff]  ;;  %v31_v33 = vld [vmem:[%s625_s1 + $0x48] sm:$0xff]  ;;  %v32_v34 = vld [vmem:[%s625_s1 + $0x50] sm:$0xff] }
   0xa   :  { %441 = vmatprep.subr.bf16.mxu0 %v440_v8  ;;  %v33_v35 = vld [vmem:[%s625_s1 + $0x58] sm:$0xff]  ;;  %v34_v36 = vld [vmem:[%s625_s1 + $0x60] sm:$0xff]  ;;  %v35_v37 = vld [vmem:[%s625_s1 + $0x68] sm:$0xff] }
   0xb   :  { %v36_v38 = vld [vmem:[%s625_s1 + $0x70] sm:$0xff]  ;;  %v37_v39 = vld [vmem:[%s625_s1 + $0x78] sm:$0xff]  ;;  %v200_v2 = vld [vmem:[%s626_s0] sm:$0xff] }
   0xc   :  { %v291_v3 = vld [vmem:[%s627_s3] ss:$0 sm:$0xff] }
   0xd   :  { %443 = vmatpush3.bf16.msra.mxu0 %v440_v8 }
   0xe   :  { %445 = vmatprep.subr.bf16.mxu0 %v444_v12 }
  0x11   :  { %447 = vmatpush3.bf16.msra.mxu0 %v444_v12 }
  0x12   :  { %449 = vmatprep.subr.bf16.mxu0 %v448_v15 }
  0x15   :  { %451 = vmatpush3.bf16.msra.mxu0 %v448_v15 }
  0x16   :  { %453 = vmatprep.subr.bf16.mxu0 %v452_v18 }
  0x19   :  { %455 = vmatpush3.bf16.msra.mxu0 %v452_v18 }
  0x1a   :  { %457 = vmatprep.subr.bf16.mxu0 %v456_v21 }
  0x1d   :  { %459 = vmatpush3.bf16.msra.mxu0 %v456_v21 }
  0x1e   :  { %461 = vmatprep.subr.bf16.mxu0 %v460_v24 }
  0x21   :  { %463 = vmatpush3.bf16.msra.mxu0 %v460_v24 }
  0x24   :  { %374 = vmatmul.mubr.f32.vlgmr.msra.gmra.mrb[0].mxu0 %v23_v25 }
  0x25   :  { %376 = vmatprep.mubr.f32.mxu0 %v24_v26 }
  0x28   :  { %377 = vmatmul.mubr.f32.gmra.mrb[2].mxu0 %v25_v27 }
  0x29   :  { %379 = vmatprep.mubr.f32.mxu0 %v26_v28 }
  0x2c   :  { %380 = vmatmul.mubr.f32.gmra.mrb[4].mxu0 %v27_v29 }
  0x2d   :  { %382 = vmatprep.mubr.f32.mxu0 %v28_v30 }
  0x30   :  { %383 = vmatmul.mubr.f32.gmra.mrb[6].mxu0 %v29_v31 }
  0x31   :  { %385 = vmatprep.mubr.f32.mxu0 %v30_v32 }
  0x34   :  { %386 = vmatmul.mubr.f32.gmra.mrb[8].mxu0 %v31_v33 }
  0x35   :  { %388 = vmatprep.mubr.f32.mxu0 %v32_v34 }
  0x38   :  { %389 = vmatmul.mubr.f32.gmra.mrb[10].mxu0 %v33_v35 }
  0x39   :  { %391 = vmatprep.mubr.f32.mxu0 %v34_v36 }
  0x3c   :  { %392 = vmatmul.mubr.f32.gmra.mrb[12].mxu0 %v35_v37 }
  0x3d   :  { %394 = vmatprep.mubr.f32.mxu0 %v36_v38 }
  0x40   :  { %395 = vmatmul.mubr.f32.gmra.mrb[14].mxu0 %v37_v39 }
  0xf7   :  { %v375_v42 = vpop.f32.mrb[0].mxu0 }
  0xf8   :  { %v120_v43 = vpop.f32.mrb[1].mxu0 }
  0xf9   :  { %v465_v44 = vpack.c.bf16 %v375_v42, %v120_v43 }
  0xfb   :  { %v378_v45 = vpop.f32.mrb[2].mxu0  ;;  %466 = vmatpush3.bf16.msra.mxu1 %v465_v44 }
  0xfc   :  { %v130_v46 = vpop.f32.mrb[3].mxu0  ;;  %467 = vmatprep.subr.bf16.mxu1 %v491_v40 }
  0xfd   :  { %v468_v47 = vpack.c.bf16 %v378_v45, %v130_v46 }
  0xff   :  { %v381_v48 = vpop.f32.mrb[4].mxu0  ;;  %469 = vmatpush3.bf16.msra.mxu1 %v468_v47 }
 0x100   :  { %v140_v49 = vpop.f32.mrb[5].mxu0  ;;  %470 = vmatprep.subr.bf16.mxu1 %v491_v40 }
 0x101   :  { %v471_v50 = vpack.c.bf16 %v381_v48, %v140_v49 }
 0x103   :  { %v384_v51 = vpop.f32.mrb[6].mxu0  ;;  %472 = vmatpush3.bf16.msra.mxu1 %v471_v50 }
 0x104   :  { %v150_v52 = vpop.f32.mrb[7].mxu0  ;;  %473 = vmatprep.subr.bf16.mxu1 %v491_v40 }
 0x105   :  { %v474_v53 = vpack.c.bf16 %v384_v51, %v150_v52 }
 0x107   :  { %v387_v54 = vpop.f32.mrb[8].mxu0  ;;  %475 = vmatpush3.bf16.msra.mxu1 %v474_v53 }
 0x108   :  { %v160_v55 = vpop.f32.mrb[9].mxu0  ;;  %476 = vmatprep.subr.bf16.mxu1 %v491_v40 }
 0x109   :  { %v477_v56 = vpack.c.bf16 %v387_v54, %v160_v55 }
 0x10b   :  { %v390_v57 = vpop.f32.mrb[10].mxu0  ;;  %478 = vmatpush3.bf16.msra.mxu1 %v477_v56 }
 0x10c   :  { %v170_v58 = vpop.f32.mrb[11].mxu0  ;;  %479 = vmatprep.subr.bf16.mxu1 %v491_v40 }
 0x10d   :  { %v480_v59 = vpack.c.bf16 %v390_v57, %v170_v58 }
 0x10f   :  { %v393_v60 = vpop.f32.mrb[12].mxu0  ;;  %481 = vmatpush3.bf16.msra.mxu1 %v480_v59 }
 0x110   :  { %v180_v61 = vpop.f32.mrb[13].mxu0  ;;  %482 = vmatprep.subr.bf16.mxu1 %v491_v40 }
 0x111   :  { %v483_v62 = vpack.c.bf16 %v393_v60, %v180_v61 }
 0x113   :  { %v396_v63 = vpop.f32.mrb[14].mxu0  ;;  %484 = vmatpush3.bf16.msra.mxu1 %v483_v62 }
 0x114   :  { %v190_v0 = vpop.f32.mrb[15].mxu0  ;;  %485 = vmatprep.subr.bf16.mxu1 %v491_v40 }
 0x115   :  { %v486_v1 = vpack.c.bf16 %v396_v63, %v190_v0 }
 0x117   :  { %487 = vmatpush3.bf16.msra.mxu1 %v486_v1 }
 0x11a   :  { %430 = vmatmul.mubr.f32.vlgmr.msra.gmra.mrb[0].mxu1 %v200_v2 }
 0x1ed   :  { %v267_v4 = vpop.f32.mrb[0].mxu1 }
 0x1ee   :  { %v284_v5 = vadd.f32 %v291_v3, %v267_v4  ;;  %v431_v6 = vpop.f32.mrb[1].mxu1 }
 0x1f0   :  { %v285_v7 = vmax.f32 %v284_v5, 0.0 }
 0x1f2   :  { %286 = vst [vmem:[%s628_s4] sm:$0xff] %v285_v7 }

// kernel: vsepacat_forward.8
= control target key start
LH: loop header
LB: loop body
LE: loop exit
PB: predicated region body
PF: predicated region fallthrough
CT: control target
= control target key end

     0   :  { %v490_v40 = vmov 0.0|0.0   ;;  %vm491_vm0 = vmmov 0   ;;  %v492_v41 = vmov 0.0   ;;  %s623_s2 = inlined_call_operand.vmem [shape: f32[128,128], index: 2, kind: input, shape index: {}]   ;;  %s624_s1 = inlined_call_operand.vmem [shape: f32[128,128], index: 1, kind: input, shape index: {}]   ;;  %s625_s0 = inlined_call_operand.vmem [shape: f32[8,128], index: 0, kind: input, shape index: {}]   ;;  %s626_s3 = inlined_call_operand.vmem [shape: f32[1,128], index: 3, kind: input, shape index: {}]   ;;  %s627_s4 = inlined_call_operand.vmem [shape: f32[8,128], index: 4, kind: output, shape index: {}]  }
   0x1   :  { %v38_v0 = vld [vmem:[%s623_s2] sm:$0xff]  ;;  %v39_v1 = vld [vmem:[%s623_s2 + $0x8] sm:$0xff]  ;;  %v40_v2 = vld [vmem:[%s623_s2 + $0x10] sm:$0xff]  ;;  %463 = vmatprep.subr.bf16.mxu1 %v490_v40  ;;  %428 = vmatprep.mubr.msk.f32.mxu1 %vm491_vm0, %v492_v41 }
   0x2   :  { %v431_v3 = vpack.c.bf16 %v39_v1, %v38_v0  ;;  %v41_v4 = vld [vmem:[%s623_s2 + $0x18] sm:$0xff]  ;;  %v42_v6 = vld [vmem:[%s623_s2 + $0x20] sm:$0xff]  ;;  %v43_v7 = vld [vmem:[%s623_s2 + $0x28] sm:$0xff] }
   0x3   :  { %v435_v5 = vpack.c.bf16 %v41_v4, %v40_v2  ;;  %v439_v8 = vpack.c.bf16 %v43_v7, %v42_v6  ;;  %v22_v9 = vld [vmem:[%s624_s1] sm:$0xff]  ;;  %v44_v10 = vld [vmem:[%s623_s2 + $0x30] sm:$0xff]  ;;  %v45_v11 = vld [vmem:[%s623_s2 + $0x38] sm:$0xff] }
   0x4   :  { %432 = vmatprep.subr.bf16.mxu0 %v431_v3  ;;  %372 = vmatprep.mubr.f32.mxu0 %v22_v9  ;;  %v443_v12 = vpack.c.bf16 %v45_v11, %v44_v10  ;;  %v46_v13 = vld [vmem:[%s623_s2 + $0x40] sm:$0xff]  ;;  %v47_v14 = vld [vmem:[%s623_s2 + $0x48] sm:$0xff]  ;;  %v48_v16 = vld [vmem:[%s623_s2 + $0x50] sm:$0xff] }
   0x5   :  { %434 = vmatpush3.bf16.msra.mxu0 %v431_v3  ;;  %v447_v15 = vpack.c.bf16 %v47_v14, %v46_v13  ;;  %v49_v17 = vld [vmem:[%s623_s2 + $0x58] sm:$0xff]  ;;  %v50_v19 = vld [vmem:[%s623_s2 + $0x60] sm:$0xff]  ;;  %v51_v20 = vld [vmem:[%s623_s2 + $0x68] sm:$0xff] }
   0x6   :  { %436 = vmatprep.subr.bf16.mxu0 %v435_v5  ;;  %v451_v18 = vpack.c.bf16 %v49_v17, %v48_v16  ;;  %v455_v21 = vpack.c.bf16 %v51_v20, %v50_v19  ;;  %v52_v22 = vld [vmem:[%s623_s2 + $0x70] sm:$0xff]  ;;  %v53_v23 = vld [vmem:[%s623_s2 + $0x78] sm:$0xff]  ;;  %v23_v25 = vld [vmem:[%s624_s1 + $0x8] sm:$0xff] }
   0x7   :  { %v459_v24 = vpack.c.bf16 %v53_v23, %v52_v22  ;;  %v24_v26 = vld [vmem:[%s624_s1 + $0x10] sm:$0xff]  ;;  %v25_v27 = vld [vmem:[%s624_s1 + $0x18] sm:$0xff]  ;;  %v26_v28 = vld [vmem:[%s624_s1 + $0x20] sm:$0xff] }
   0x8   :  { %v27_v29 = vld [vmem:[%s624_s1 + $0x28] sm:$0xff]  ;;  %v28_v30 = vld [vmem:[%s624_s1 + $0x30] sm:$0xff]  ;;  %v29_v31 = vld [vmem:[%s624_s1 + $0x38] sm:$0xff] }
   0x9   :  { %438 = vmatpush3.bf16.msra.mxu0 %v435_v5  ;;  %v30_v32 = vld [vmem:[%s624_s1 + $0x40] sm:$0xff]  ;;  %v31_v33 = vld [vmem:[%s624_s1 + $0x48] sm:$0xff]  ;;  %v32_v34 = vld [vmem:[%s624_s1 + $0x50] sm:$0xff] }
   0xa   :  { %440 = vmatprep.subr.bf16.mxu0 %v439_v8  ;;  %v33_v35 = vld [vmem:[%s624_s1 + $0x58] sm:$0xff]  ;;  %v34_v36 = vld [vmem:[%s624_s1 + $0x60] sm:$0xff]  ;;  %v35_v37 = vld [vmem:[%s624_s1 + $0x68] sm:$0xff] }
   0xb   :  { %v36_v38 = vld [vmem:[%s624_s1 + $0x70] sm:$0xff]  ;;  %v37_v39 = vld [vmem:[%s624_s1 + $0x78] sm:$0xff]  ;;  %v200_v2 = vld [vmem:[%s625_s0] sm:$0xff] }
   0xc   :  { %v290_v3 = vld [vmem:[%s626_s3] ss:$0 sm:$0xff] }
   0xd   :  { %442 = vmatpush3.bf16.msra.mxu0 %v439_v8 }
   0xe   :  { %444 = vmatprep.subr.bf16.mxu0 %v443_v12 }
  0x11   :  { %446 = vmatpush3.bf16.msra.mxu0 %v443_v12 }
  0x12   :  { %448 = vmatprep.subr.bf16.mxu0 %v447_v15 }
  0x15   :  { %450 = vmatpush3.bf16.msra.mxu0 %v447_v15 }
  0x16   :  { %452 = vmatprep.subr.bf16.mxu0 %v451_v18 }
  0x19   :  { %454 = vmatpush3.bf16.msra.mxu0 %v451_v18 }
  0x1a   :  { %456 = vmatprep.subr.bf16.mxu0 %v455_v21 }
  0x1d   :  { %458 = vmatpush3.bf16.msra.mxu0 %v455_v21 }
  0x1e   :  { %460 = vmatprep.subr.bf16.mxu0 %v459_v24 }
  0x21   :  { %462 = vmatpush3.bf16.msra.mxu0 %v459_v24 }
  0x24   :  { %373 = vmatmul.mubr.f32.vlgmr.msra.gmra.mrb[0].mxu0 %v23_v25 }
  0x25   :  { %375 = vmatprep.mubr.f32.mxu0 %v24_v26 }
  0x28   :  { %376 = vmatmul.mubr.f32.gmra.mrb[2].mxu0 %v25_v27 }
  0x29   :  { %378 = vmatprep.mubr.f32.mxu0 %v26_v28 }
  0x2c   :  { %379 = vmatmul.mubr.f32.gmra.mrb[4].mxu0 %v27_v29 }
  0x2d   :  { %381 = vmatprep.mubr.f32.mxu0 %v28_v30 }
  0x30   :  { %382 = vmatmul.mubr.f32.gmra.mrb[6].mxu0 %v29_v31 }
  0x31   :  { %384 = vmatprep.mubr.f32.mxu0 %v30_v32 }
  0x34   :  { %385 = vmatmul.mubr.f32.gmra.mrb[8].mxu0 %v31_v33 }
  0x35   :  { %387 = vmatprep.mubr.f32.mxu0 %v32_v34 }
  0x38   :  { %388 = vmatmul.mubr.f32.gmra.mrb[10].mxu0 %v33_v35 }
  0x39   :  { %390 = vmatprep.mubr.f32.mxu0 %v34_v36 }
  0x3c   :  { %391 = vmatmul.mubr.f32.gmra.mrb[12].mxu0 %v35_v37 }
  0x3d   :  { %393 = vmatprep.mubr.f32.mxu0 %v36_v38 }
  0x40   :  { %394 = vmatmul.mubr.f32.gmra.mrb[14].mxu0 %v37_v39 }
  0xf7   :  { %v374_v42 = vpop.f32.mrb[0].mxu0 }
  0xf8   :  { %v120_v43 = vpop.f32.mrb[1].mxu0 }
  0xf9   :  { %v464_v44 = vpack.c.bf16 %v374_v42, %v120_v43 }
  0xfb   :  { %v377_v45 = vpop.f32.mrb[2].mxu0  ;;  %465 = vmatpush3.bf16.msra.mxu1 %v464_v44 }
  0xfc   :  { %v130_v46 = vpop.f32.mrb[3].mxu0  ;;  %466 = vmatprep.subr.bf16.mxu1 %v490_v40 }
  0xfd   :  { %v467_v47 = vpack.c.bf16 %v377_v45, %v130_v46 }
  0xff   :  { %v380_v48 = vpop.f32.mrb[4].mxu0  ;;  %468 = vmatpush3.bf16.msra.mxu1 %v467_v47 }
 0x100   :  { %v140_v49 = vpop.f32.mrb[5].mxu0  ;;  %469 = vmatprep.subr.bf16.mxu1 %v490_v40 }
 0x101   :  { %v470_v50 = vpack.c.bf16 %v380_v48, %v140_v49 }
 0x103   :  { %v383_v51 = vpop.f32.mrb[6].mxu0  ;;  %471 = vmatpush3.bf16.msra.mxu1 %v470_v50 }
 0x104   :  { %v150_v52 = vpop.f32.mrb[7].mxu0  ;;  %472 = vmatprep.subr.bf16.mxu1 %v490_v40 }
 0x105   :  { %v473_v53 = vpack.c.bf16 %v383_v51, %v150_v52 }
 0x107   :  { %v386_v54 = vpop.f32.mrb[8].mxu0  ;;  %474 = vmatpush3.bf16.msra.mxu1 %v473_v53 }
 0x108   :  { %v160_v55 = vpop.f32.mrb[9].mxu0  ;;  %475 = vmatprep.subr.bf16.mxu1 %v490_v40 }
 0x109   :  { %v476_v56 = vpack.c.bf16 %v386_v54, %v160_v55 }
 0x10b   :  { %v389_v57 = vpop.f32.mrb[10].mxu0  ;;  %477 = vmatpush3.bf16.msra.mxu1 %v476_v56 }
 0x10c   :  { %v170_v58 = vpop.f32.mrb[11].mxu0  ;;  %478 = vmatprep.subr.bf16.mxu1 %v490_v40 }
 0x10d   :  { %v479_v59 = vpack.c.bf16 %v389_v57, %v170_v58 }
 0x10f   :  { %v392_v60 = vpop.f32.mrb[12].mxu0  ;;  %480 = vmatpush3.bf16.msra.mxu1 %v479_v59 }
 0x110   :  { %v180_v61 = vpop.f32.mrb[13].mxu0  ;;  %481 = vmatprep.subr.bf16.mxu1 %v490_v40 }
 0x111   :  { %v482_v62 = vpack.c.bf16 %v392_v60, %v180_v61 }
 0x113   :  { %v395_v63 = vpop.f32.mrb[14].mxu0  ;;  %483 = vmatpush3.bf16.msra.mxu1 %v482_v62 }
 0x114   :  { %v190_v0 = vpop.f32.mrb[15].mxu0  ;;  %484 = vmatprep.subr.bf16.mxu1 %v490_v40 }
 0x115   :  { %v485_v1 = vpack.c.bf16 %v395_v63, %v190_v0 }
 0x117   :  { %486 = vmatpush3.bf16.msra.mxu1 %v485_v1 }
 0x11a   :  { %429 = vmatmul.mubr.f32.vlgmr.msra.gmra.mrb[0].mxu1 %v200_v2 }
 0x1ed   :  { %v267_v4 = vpop.f32.mrb[0].mxu1 }
 0x1ee   :  { %v284_v5 = vadd.f32 %v290_v3, %v267_v4  ;;  %v430_v6 = vpop.f32.mrb[1].mxu1 }
 0x1f0   :  { %285 = vst [vmem:[%s627_s4] sm:$0xff] %v284_v5 }

// kernel: vsepacat_forward.13
= control target key start
LH: loop header
LB: loop body
LE: loop exit
PB: predicated region body
PF: predicated region fallthrough
CT: control target
= control target key end

     0   :  { %v253_v3 = vmov 0.0|0.0   ;;  %vm254_vm0 = vmmov 0   ;;  %v255_v6 = vmov 0.0   ;;  %s343_s0 = inlined_call_operand.vmem [shape: f32[8,128], index: 0, kind: input, shape index: {}]   ;;  %s344_s1 = inlined_call_operand.vmem [shape: f32[128,128], index: 1, kind: input, shape index: {}]   ;;  %s345_s2 = inlined_call_operand.vmem [shape: f32[1,128], index: 2, kind: input, shape index: {}]   ;;  %s346_s3 = inlined_call_operand.hbm [shape: f32[8,128], index: 3, kind: output, shape index: {}]  }
   0x1   :  { %v22_v0 = vld [vmem:[%s344_s1] sm:$0xff]  ;;  %v23_v1 = vld [vmem:[%s344_s1 + $0x8] sm:$0xff]  ;;  %v24_v2 = vld [vmem:[%s344_s1 + $0x10] sm:$0xff]  ;;  %197 = vmatprep.subr.bf16.mxu0 %v253_v3  ;;  %194 = vmatprep.mubr.msk.f32.mxu0 %vm254_vm0, %v255_v6 }
   0x2   :  { %v198_v4 = vpack.c.bf16 %v23_v1, %v22_v0  ;;  %v25_v5 = vld [vmem:[%s344_s1 + $0x18] sm:$0xff]  ;;  %v26_v8 = vld [vmem:[%s344_s1 + $0x20] sm:$0xff]  ;;  %v27_v9 = vld [vmem:[%s344_s1 + $0x28] sm:$0xff] }
   0x3   :  { %v201_v7 = vpack.c.bf16 %v25_v5, %v24_v2 }
   0x4   :  { %199 = vmatpush3.bf16.msra.mxu0 %v198_v4 }
   0x5   :  { %200 = vmatprep.subr.bf16.mxu0 %v253_v3 }
   0x6   :  { %8 = vsyncpa [#allocation4], 0  ;;  %v204_v10 = vpack.c.bf16 %v27_v9, %v26_v8  ;;  %v28_v11 = vld [vmem:[%s344_s1 + $0x30] sm:$0xff]  ;;  %v29_v12 = vld [vmem:[%s344_s1 + $0x38] sm:$0xff] }
   0x7   :  { %v207_v13 = vpack.c.bf16 %v29_v12, %v28_v11  ;;  %v30_v14 = vld [vmem:[%s344_s1 + $0x40] sm:$0xff]  ;;  %v31_v15 = vld [vmem:[%s344_s1 + $0x48] sm:$0xff]  ;;  %v32_v17 = vld [vmem:[%s344_s1 + $0x50] sm:$0xff] }
   0x8   :  { %202 = vmatpush3.bf16.msra.mxu0 %v201_v7  ;;  %v210_v16 = vpack.c.bf16 %v31_v15, %v30_v14  ;;  %v33_v18 = vld [vmem:[%s344_s1 + $0x58] sm:$0xff]  ;;  %v34_v20 = vld [vmem:[%s344_s1 + $0x60] sm:$0xff]  ;;  %v35_v21 = vld [vmem:[%s344_s1 + $0x68] sm:$0xff] }
   0x9   :  { %203 = vmatprep.subr.bf16.mxu0 %v253_v3  ;;  %v213_v19 = vpack.c.bf16 %v33_v18, %v32_v17  ;;  %v216_v22 = vpack.c.bf16 %v35_v21, %v34_v20  ;;  %v36_v23 = vld [vmem:[%s344_s1 + $0x70] sm:$0xff]  ;;  %v37_v24 = vld [vmem:[%s344_s1 + $0x78] sm:$0xff]  ;;  %v21_v26 = vld [vmem:[%s343_s0] sm:$0xff]  ;;  %s256_s1 = smov [#allocation3]  }
   0xa   :  { %v219_v25 = vpack.c.bf16 %v37_v24, %v36_v23  ;;  %v143_v27 = vld [vmem:[%s345_s2] ss:$0 sm:$0xff]  ;;  %s135_s21 = sshll.u32 %s256_s1, 4  ;;  %s136_s21 = int_to_ptr.vmem [resolvable:$true] %s135_s21 }
   0xb   :  { %s229_s22 = scalar_lea.vmem %s136_s21, 128  ;;  %p234_p1 = scmp.lt.s32.totalorder %s136_s21, %s136_s21 }
   0xc   :  { %205 = vmatpush3.bf16.msra.mxu0 %v204_v10  ;;  %p230_p0 = scmp.ne.s32.totalorder %s136_s21, %s229_s22  ;;  %p235_p2 = scmp.lt.s32.totalorder %s229_s22, %s229_s22 }
   0xd   :  { %206 = vmatprep.subr.bf16.mxu0 %v253_v3 }
   0xe   :  { %p236_p3 = por %p235_p2, %p234_p1 }
  0x10   :  { %208 = vmatpush3.bf16.msra.mxu0 %v207_v13  ;;  %p237_p4 = pnand %p236_p3, %p230_p0 }
  0x11   :  { %209 = vmatprep.subr.bf16.mxu0 %v253_v3 }
  0x14   :  { %211 = vmatpush3.bf16.msra.mxu0 %v210_v16 }
  0x15   :  { %212 = vmatprep.subr.bf16.mxu0 %v253_v3 }
  0x18   :  { %214 = vmatpush3.bf16.msra.mxu0 %v213_v19 }
  0x19   :  { %215 = vmatprep.subr.bf16.mxu0 %v253_v3 }
  0x1c   :  { %217 = vmatpush3.bf16.msra.mxu0 %v216_v22 }
  0x1d   :  { %218 = vmatprep.subr.bf16.mxu0 %v253_v3 }
  0x20   :  { %220 = vmatpush3.bf16.msra.mxu0 %v219_v25 }
  0x23   :  { %195 = vmatmul.mubr.f32.vlgmr.msra.gmra.mrb[0].mxu0 %v21_v26 }
  0xf6   :  { %v104_v28 = vpop.f32.mrb[0].mxu0 }
  0xf7   :  { %v121_v29 = vadd.f32 %v143_v27, %v104_v28  ;;  %v196_v30 = vpop.f32.mrb[1].mxu0 }
  0xf9   :  { %v144_v31 = vmul.f32 -1.442695, %v121_v29 }
  0xfb   :  { %225 = vpow2.f32 %v144_v31 }
 0x105   :  { %v226_v32 = vpop.eup %225 }
 0x106   :  { %v125_v33 = vadd.f32 1.0, %v226_v32 }
 0x108   :  { %227 = vrcp.f32 %v125_v33 }
 0x112   :  { %v228_v34 = vpop.eup %227 }
 0x113   :  { %128 = vst [vmem:[#allocation3] sm:$0xff] %v228_v34 }
 0x114   :  { %240 = shalt.err (!%p237_p4)
}
 0x115   :  { %s241_s23 = scalar_lea.hbm %s346_s3, 128 }
 0x116   :  { %p242_p5 = scmp.ne.s32.totalorder %s346_s3, %s241_s23  ;;  %p245_p6 = scmp.lt.u32.totalorder %s241_s23, %s346_s3 }
 0x118   :  { %p247_p7 = pnand %p245_p6, %p242_p5 }
 0x11a   :  { %250 = shalt.err (!%p247_p7)
}
 0x11b   :  { %138 = dma.vmem_to_hbm [thread:$0]  %s136_s21, 128, %s346_s3, [#allocation4]  }
 0x11c   :  { %251 = dma.done.wait [#allocation4], 128  }
 0x11d   :  { %252 = vsyncadd [#allocation4], 4294967168 }
 0x11e   :  { %142 = vsyncpa [#allocation4], 1 }

</bundles_post_ra>
